<compile_context>
chip_gen: v7x
topology: tpu7x:2x2x1
jax: 0.10.0
libtpu: 0.0.40
codegen_flags: <defaults>
</compile_context>

<pallas_src>
import jax
import jax.numpy as jnp
from jax.experimental import pallas as pl
from jax.experimental.pallas import tpu as pltpu


def _round_up(x, m):
    return ((x + m - 1) // m) * m


# ----------------------------- Pallas kernel ------------------------------ #
def actor_kernel(x_ref,
                 w1_ref, b1_ref,        # shared layer          (S, H1p)
                 w2_ref, b2_ref,        # fused head hidden      (H1p, 2*H2p)
                 w3m_ref, b3m_ref,      # mu output              (H2p, Ap)
                 w3s_ref, b3s_ref,      # sigma output           (H2p, Ap)
                 out_ref):              # fused output           (TB, 2*Ap)
    # activations stay f32 (VPU/EUP); cast to bf16 only at the MXU boundary
    x = x_ref[...].astype(jnp.bfloat16)

    h1 = jnp.dot(x, w1_ref[...], preferred_element_type=jnp.float32) + b1_ref[...]
    h1 = jnp.maximum(h1, 0.0)

    h2 = jnp.dot(h1.astype(jnp.bfloat16), w2_ref[...],
                 preferred_element_type=jnp.float32) + b2_ref[...]
    h2 = jnp.maximum(h2, 0.0)
    h2b = h2.astype(jnp.bfloat16)

    # block-diagonal layer-3 done as two dense matmuls on static half-slices
    half = h2b.shape[-1] // 2
    zm = jnp.dot(h2b[:, :half], w3m_ref[...],
                 preferred_element_type=jnp.float32) + b3m_ref[...]
    zs = jnp.dot(h2b[:, half:], w3s_ref[...],
                 preferred_element_type=jnp.float32) + b3s_ref[...]

    # transcendentals only over each head's own lanes; static-slice stores
    ap = zm.shape[-1]
    out_ref[:, :ap] = jnp.tanh(zm)
    out_ref[:, ap:] = jax.nn.sigmoid(zs)


# ------------------------------ wrapper ----------------------------------- #
def _choose_batch_tiles(B, cap=1024):
    """Pick (TB, B_pad): TB multiple of 8, TB <= cap, tiny padding waste,
    and >= 2 grid steps for big batches so both v7x TensorCores get work."""
    b_r = _round_up(B, 8)
    n_steps = max(1, -(-b_r // cap))
    if n_steps == 1 and b_r >= 512:
        n_steps = 2
    tb = _round_up(-(-b_r // n_steps), 8)
    return tb, n_steps * tb


def actor_forward(state, packed, action_dim):
    """state: (B, state_dim) f32.  Returns (mu, sigma), each (B, action_dim)."""
    B, S = state.shape
    w1, b1 = packed["w1"], packed["b1"]
    w2, b2 = packed["w2"], packed["b2"]
    w3m, b3m = packed["w3m"], packed["b3m"]
    w3s, b3s = packed["w3s"], packed["b3s"]
    h1p = w1.shape[1]
    h2p2 = w2.shape[1]
    h2p = h2p2 // 2
    ap = w3m.shape[1]
    out_w = 2 * ap

    TB, B_pad = _choose_batch_tiles(B)
    if B_pad != B:
        state = jnp.pad(state, ((0, B_pad - B), (0, 0)))

    # VMEM budget: in/out double-buffered, bf16 weights, f32 temporaries
    vmem_est = (2 * TB * S * 4 + 2 * TB * out_w * 4
                + (S * h1p + h1p * h2p2 + 2 * h2p * ap) * 2
                + (h1p + h2p2 + 2 * ap) * 4
                + TB * (h1p + h2p2 + 2 * ap) * 4)
    vmem_limit = int(min(48 * 1024 * 1024, max(32 * 1024 * 1024, 2 * vmem_est)))

    const = lambda i: (0, 0)
    out = pl.pallas_call(
        actor_kernel,
        out_shape=jax.ShapeDtypeStruct((B_pad, out_w), jnp.float32),
        grid=(B_pad // TB,),
        in_specs=[
            pl.BlockSpec((TB, S), lambda i: (i, 0)),
            pl.BlockSpec((S, h1p), const),
            pl.BlockSpec((1, h1p), const),
            pl.BlockSpec((h1p, h2p2), const),
            pl.BlockSpec((1, h2p2), const),
            pl.BlockSpec((h2p, ap), const),
            pl.BlockSpec((1, ap), const),
            pl.BlockSpec((h2p, ap), const),
            pl.BlockSpec((1, ap), const),
        ],
        out_specs=pl.BlockSpec((TB, out_w), lambda i: (i, 0)),
        compiler_params=pltpu.CompilerParams(
            dimension_semantics=("parallel",),
            vmem_limit_bytes=vmem_limit),
    )(state, w1, b1, w2, b2, w3m, b3m, w3s, b3s)

    mu = out[:B, :action_dim]
    sigma = out[:B, ap:ap + action_dim]
    return mu, sigma


# -------------------------- parameter init -------------------------------- #
def _orthogonal(key, out_features, in_features, gain):
    """Mimics torch.nn.init.orthogonal_ on a (out, in) weight; returns (in, out)."""
    rows, cols = out_features, in_features
    a = jax.random.normal(key, (max(rows, cols), min(rows, cols)), dtype=jnp.float32)
    q, r = jnp.linalg.qr(a)
    d = jnp.diag(r)
    q = q * jnp.where(d >= 0, 1.0, -1.0)   # deterministic-sign orthogonal
    if rows < cols:
        q = q.T
    w_out_in = gain * q[:rows, :cols]
    return w_out_in.T                       # (in, out) layout for y = x @ W + b


def init_actor_params(key, state_dim, action_dim, hidden_1=400, hidden_2=200):
    # PyTorch applies orthogonal(gain=sqrt(2)) to ALL Linear layers (including
    # the tanh/sigmoid outputs); we match that exactly.
    gain_relu = float(jnp.sqrt(2.0))
    ks = jax.random.split(key, 5)
    return {
        "w1":  _orthogonal(ks[0], hidden_1, state_dim, gain_relu),
        "b1":  jnp.zeros((hidden_1,), jnp.float32),
        "w2m": _orthogonal(ks[1], hidden_2, hidden_1, gain_relu),
        "b2m": jnp.zeros((hidden_2,), jnp.float32),
        "w3m": _orthogonal(ks[2], action_dim, hidden_2, gain_relu),
        "b3m": jnp.zeros((action_dim,), jnp.float32),
        "w2s": _orthogonal(ks[3], hidden_2, hidden_1, gain_relu),
        "b2s": jnp.zeros((hidden_2,), jnp.float32),
        "w3s": _orthogonal(ks[4], action_dim, hidden_2, gain_relu),
        "b3s": jnp.zeros((action_dim,), jnp.float32),
    }


def pack_actor_params(p):
    """Fuse the two head-hidden layers, zero-pad dims, cast weights bf16.
    Layer-3 stays as two separate (H2p, Ap) blocks (no structural zeros)."""
    state_dim, h1 = p["w1"].shape
    h2 = p["w2m"].shape[1]
    a = p["w3m"].shape[1]
    h1p = _round_up(h1, 128)
    h2p = _round_up(h2, 128)
    # pad each head's output to 64 when possible -> fused out is one 128-lane slab
    ap = 64 if a <= 64 else _round_up(a, 128)

    def padw(w, r, c):
        return jnp.pad(w, ((0, r - w.shape[0]), (0, c - w.shape[1])))

    w1 = padw(p["w1"], state_dim, h1p)
    b1 = jnp.pad(p["b1"], (0, h1p - h1))[None, :]

    # fused hidden layer of both heads: (H1p, 2*H2p)
    w2 = jnp.concatenate([padw(p["w2m"], h1p, h2p),
                          padw(p["w2s"], h1p, h2p)], axis=1)
    b2 = jnp.concatenate([jnp.pad(p["b2m"], (0, h2p - h2)),
                          jnp.pad(p["b2s"], (0, h2p - h2))])[None, :]

    w3m = padw(p["w3m"], h2p, ap)
    b3m = jnp.pad(p["b3m"], (0, ap - a))[None, :]
    w3s = padw(p["w3s"], h2p, ap)
    b3s = jnp.pad(p["b3s"], (0, ap - a))[None, :]

    return {
        "w1": w1.astype(jnp.bfloat16), "b1": b1,
        "w2": w2.astype(jnp.bfloat16), "b2": b2,
        "w3m": w3m.astype(jnp.bfloat16), "b3m": b3m,
        "w3s": w3s.astype(jnp.bfloat16), "b3s": b3s,
    }


# ------------------------------ references -------------------------------- #
def actor_ref_fused(state, packed, action_dim):
    """Exact mirror of the kernel math (bf16 operands, f32 accumulation)."""
    xb = state.astype(jnp.bfloat16)
    h1 = jnp.maximum(jnp.dot(xb, packed["w1"],
                             preferred_element_type=jnp.float32) + packed["b1"], 0.0)
    h2 = jnp.maximum(jnp.dot(h1.astype(jnp.bfloat16), packed["w2"],
                             preferred_element_type=jnp.float32) + packed["b2"], 0.0)
    h2b = h2.astype(jnp.bfloat16)
    half = h2b.shape[-1] // 2
    zm = jnp.dot(h2b[:, :half], packed["w3m"],
                 preferred_element_type=jnp.float32) + packed["b3m"]
    zs = jnp.dot(h2b[:, half:], packed["w3s"],
                 preferred_element_type=jnp.float32) + packed["b3s"]
    return jnp.tanh(zm[:, :action_dim]), jax.nn.sigmoid(zs[:, :action_dim])


def actor_ref_f32(state, p):
    """Un-fused, un-padded f32 reference matching the PyTorch module."""
    h = jax.nn.relu(state @ p["w1"] + p["b1"])
    mu = jnp.tanh(jax.nn.relu(h @ p["w2m"] + p["b2m"]) @ p["w3m"] + p["b3m"])
    sg = jax.nn.sigmoid(jax.nn.relu(h @ p["w2s"] + p["b2s"]) @ p["w3s"] + p["b3s"])
    return mu, sg


if __name__ == "__main__":
    key = jax.random.PRNGKey(0)
    k_state, k_params = jax.random.split(key)

    batch, state_dim, action_dim = 8, 16, 4
    state = jax.random.normal(k_state, (batch, state_dim), dtype=jnp.float32)
    params = init_actor_params(k_params, state_dim, action_dim)
    packed = pack_actor_params(params)

    mu, sigma = actor_forward(state, packed, action_dim)
    jax.block_until_ready((mu, sigma))

    assert mu.shape == (batch, action_dim) and sigma.shape == (batch, action_dim)

    # tight check against the bit-equivalent fused bf16 computation
    mu_f, sg_f = actor_ref_fused(state, packed, action_dim)
    assert jnp.allclose(mu, mu_f, atol=2e-3, rtol=2e-3)
    assert jnp.allclose(sigma, sg_f, atol=2e-3, rtol=2e-3)

    # fidelity check against the full-f32 un-fused module semantics
    mu_r, sg_r = actor_ref_f32(state, params)
    assert jnp.allclose(mu, mu_r, atol=5e-2, rtol=5e-2)
    assert jnp.allclose(sigma, sg_r, atol=5e-2, rtol=5e-2)

    print("KERNEL_OK")
</pallas_src>

<mosaic_0001>
module attributes {stable_mosaic.version = 11 : i64} {
  func.func @actor_kernel(%arg0: i32, %arg1: memref<8x16xf32, #tpu.memory_space<vmem>>, %arg2: memref<16x512xbf16, #tpu.memory_space<vmem>>, %arg3: memref<1x512xf32, #tpu.memory_space<vmem>>, %arg4: memref<512x512xbf16, #tpu.memory_space<vmem>>, %arg5: memref<1x512xf32, #tpu.memory_space<vmem>>, %arg6: memref<256x64xbf16, #tpu.memory_space<vmem>>, %arg7: memref<1x64xf32, #tpu.memory_space<vmem>>, %arg8: memref<256x64xbf16, #tpu.memory_space<vmem>>, %arg9: memref<1x64xf32, #tpu.memory_space<vmem>>, %arg10: memref<8x128xf32, #tpu.memory_space<vmem>>) attributes {dimension_semantics = [#tpu.dimension_semantics<parallel>], iteration_bounds = array<i64: 1>, scalar_prefetch = 0 : i64, scratch_operands = 0 : i64, tpu.core_type = #tpu.core_type<tc>, window_params = [{transform_indices = @transform_0, window_bounds = array<i64: 8, 16>}, {pipeline_mode = #tpu.pipeline_mode<synchronous>, transform_indices = @transform_1, window_bounds = array<i64: 16, 512>}, {pipeline_mode = #tpu.pipeline_mode<synchronous>, transform_indices = @transform_2, window_bounds = array<i64: 1, 512>}, {pipeline_mode = #tpu.pipeline_mode<synchronous>, transform_indices = @transform_3, window_bounds = array<i64: 512, 512>}, {pipeline_mode = #tpu.pipeline_mode<synchronous>, transform_indices = @transform_4, window_bounds = array<i64: 1, 512>}, {pipeline_mode = #tpu.pipeline_mode<synchronous>, transform_indices = @transform_5, window_bounds = array<i64: 256, 64>}, {pipeline_mode = #tpu.pipeline_mode<synchronous>, transform_indices = @transform_6, window_bounds = array<i64: 1, 64>}, {pipeline_mode = #tpu.pipeline_mode<synchronous>, transform_indices = @transform_7, window_bounds = array<i64: 256, 64>}, {pipeline_mode = #tpu.pipeline_mode<synchronous>, transform_indices = @transform_8, window_bounds = array<i64: 1, 64>}, {transform_indices = @transform_9, window_bounds = array<i64: 8, 128>}]} {
    %c0 = arith.constant 0 : index
    %c0_0 = arith.constant 0 : index
    %0 = vector.load %arg1[%c0, %c0_0] : memref<8x16xf32, #tpu.memory_space<vmem>>, vector<8x16xf32>
    %1 = arith.truncf %0 : vector<8x16xf32> to vector<8x16xbf16>
    %c0_1 = arith.constant 0 : index
    %c0_2 = arith.constant 0 : index
    %2 = vector.load %arg2[%c0_1, %c0_2] : memref<16x512xbf16, #tpu.memory_space<vmem>>, vector<16x512xbf16>
    %cst = arith.constant dense<0.000000e+00> : vector<8x512xf32>
    %3 = tpu.matmul %1, %2, %cst {dimension_numbers = #tpu.dot_dimension_numbers<[1], [0], [0], [1], [0, 0, 1, 1], [], []>} : vector<8x16xbf16>, vector<16x512xbf16>, vector<8x512xf32> -> vector<8x512xf32>
    %c0_3 = arith.constant 0 : index
    %c0_4 = arith.constant 0 : index
    %4 = vector.load %arg3[%c0_3, %c0_4] : memref<1x512xf32, #tpu.memory_space<vmem>>, vector<1x512xf32>
    %5 = vector.broadcast %4 : vector<1x512xf32> to vector<8x512xf32>
    %6 = arith.addf %3, %5 : vector<8x512xf32>
    %cst_5 = arith.constant 0.000000e+00 : f32
    %7 = vector.broadcast %cst_5 : f32 to vector<8x512xf32>
    %8 = arith.maximumf %6, %7 : vector<8x512xf32>
    %9 = arith.truncf %8 : vector<8x512xf32> to vector<8x512xbf16>
    %c0_6 = arith.constant 0 : index
    %c0_7 = arith.constant 0 : index
    %10 = vector.load %arg4[%c0_6, %c0_7] : memref<512x512xbf16, #tpu.memory_space<vmem>>, vector<512x512xbf16>
    %cst_8 = arith.constant dense<0.000000e+00> : vector<8x512xf32>
    %11 = tpu.matmul %9, %10, %cst_8 {dimension_numbers = #tpu.dot_dimension_numbers<[1], [0], [0], [1], [0, 0, 1, 1], [], []>} : vector<8x512xbf16>, vector<512x512xbf16>, vector<8x512xf32> -> vector<8x512xf32>
    %c0_9 = arith.constant 0 : index
    %c0_10 = arith.constant 0 : index
    %12 = vector.load %arg5[%c0_9, %c0_10] : memref<1x512xf32, #tpu.memory_space<vmem>>, vector<1x512xf32>
    %13 = vector.broadcast %12 : vector<1x512xf32> to vector<8x512xf32>
    %14 = arith.addf %11, %13 : vector<8x512xf32>
    %cst_11 = arith.constant 0.000000e+00 : f32
    %15 = vector.broadcast %cst_11 : f32 to vector<8x512xf32>
    %16 = arith.maximumf %14, %15 : vector<8x512xf32>
    %17 = arith.truncf %16 : vector<8x512xf32> to vector<8x512xbf16>
    %18 = vector.extract_strided_slice %17 {offsets = [0, 0], sizes = [8, 256], strides = [1, 1]} : vector<8x512xbf16> to vector<8x256xbf16>
    %c0_12 = arith.constant 0 : index
    %c0_13 = arith.constant 0 : index
    %19 = vector.load %arg6[%c0_12, %c0_13] : memref<256x64xbf16, #tpu.memory_space<vmem>>, vector<256x64xbf16>
    %cst_14 = arith.constant dense<0.000000e+00> : vector<8x64xf32>
    %20 = tpu.matmul %18, %19, %cst_14 {dimension_numbers = #tpu.dot_dimension_numbers<[1], [0], [0], [1], [0, 0, 1, 1], [], []>} : vector<8x256xbf16>, vector<256x64xbf16>, vector<8x64xf32> -> vector<8x64xf32>
    %c0_15 = arith.constant 0 : index
    %c0_16 = arith.constant 0 : index
    %21 = vector.load %arg7[%c0_15, %c0_16] : memref<1x64xf32, #tpu.memory_space<vmem>>, vector<1x64xf32>
    %22 = vector.broadcast %21 : vector<1x64xf32> to vector<8x64xf32>
    %23 = arith.addf %20, %22 : vector<8x64xf32>
    %24 = vector.extract_strided_slice %17 {offsets = [0, 256], sizes = [8, 256], strides = [1, 1]} : vector<8x512xbf16> to vector<8x256xbf16>
    %c0_17 = arith.constant 0 : index
    %c0_18 = arith.constant 0 : index
    %25 = vector.load %arg8[%c0_17, %c0_18] : memref<256x64xbf16, #tpu.memory_space<vmem>>, vector<256x64xbf16>
    %cst_19 = arith.constant dense<0.000000e+00> : vector<8x64xf32>
    %26 = tpu.matmul %24, %25, %cst_19 {dimension_numbers = #tpu.dot_dimension_numbers<[1], [0], [0], [1], [0, 0, 1, 1], [], []>} : vector<8x256xbf16>, vector<256x64xbf16>, vector<8x64xf32> -> vector<8x64xf32>
    %c0_20 = arith.constant 0 : index
    %c0_21 = arith.constant 0 : index
    %27 = vector.load %arg9[%c0_20, %c0_21] : memref<1x64xf32, #tpu.memory_space<vmem>>, vector<1x64xf32>
    %28 = vector.broadcast %27 : vector<1x64xf32> to vector<8x64xf32>
    %29 = arith.addf %26, %28 : vector<8x64xf32>
    %30 = math.tanh %23 : vector<8x64xf32>
    %c0_22 = arith.constant 0 : index
    %c0_23 = arith.constant 0 : index
    %31 = vector.load %arg10[%c0_22, %c0_23] : memref<8x128xf32, #tpu.memory_space<vmem>>, vector<8x64xf32>
    tpu.vector_store %arg10[%c0_22, %c0_23], %30 {strides = array<i32>} : memref<8x128xf32, #tpu.memory_space<vmem>>, vector<8x64xf32>,
    %32 = arith.negf %29 : vector<8x64xf32>
    %33 = math.exp %32 : vector<8x64xf32>
    %cst_24 = arith.constant 1.000000e+00 : f32
    %34 = vector.broadcast %cst_24 : f32 to vector<8x64xf32>
    %35 = arith.addf %34, %33 : vector<8x64xf32>
    %36 = arith.divf %34, %35 : vector<8x64xf32>
    %c0_25 = arith.constant 0 : index
    %c64 = arith.constant 64 : index
    %37 = vector.load %arg10[%c0_25, %c64] : memref<8x128xf32, #tpu.memory_space<vmem>>, vector<8x64xf32>
    tpu.vector_store %arg10[%c0_25, %c64], %36 {strides = array<i32>} : memref<8x128xf32, #tpu.memory_space<vmem>>, vector<8x64xf32>,
    return
  }
  func.func @transform_0(%arg0: i32) -> (i32, i32) {
    %c0_i32 = arith.constant 0 : i32
    %c0_i32_0 = arith.constant 0 : i32
    return %arg0, %c0_i32 : i32, i32
  }
  func.func @transform_1(%arg0: i32) -> (i32, i32) {
    %c0_i32 = arith.constant 0 : i32
    %c0_i32_0 = arith.constant 0 : i32
    %c0_i32_1 = arith.constant 0 : i32
    return %c0_i32, %c0_i32_0 : i32, i32
  }
  func.func @transform_2(%arg0: i32) -> (i32, i32) {
    %c0_i32 = arith.constant 0 : i32
    %c0_i32_0 = arith.constant 0 : i32
    %c0_i32_1 = arith.constant 0 : i32
    return %c0_i32, %c0_i32_0 : i32, i32
  }
  func.func @transform_3(%arg0: i32) -> (i32, i32) {
    %c0_i32 = arith.constant 0 : i32
    %c0_i32_0 = arith.constant 0 : i32
    %c0_i32_1 = arith.constant 0 : i32
    return %c0_i32, %c0_i32_0 : i32, i32
  }
  func.func @transform_4(%arg0: i32) -> (i32, i32) {
    %c0_i32 = arith.constant 0 : i32
    %c0_i32_0 = arith.constant 0 : i32
    %c0_i32_1 = arith.constant 0 : i32
    return %c0_i32, %c0_i32_0 : i32, i32
  }
  func.func @transform_5(%arg0: i32) -> (i32, i32) {
    %c0_i32 = arith.constant 0 : i32
    %c0_i32_0 = arith.constant 0 : i32
    %c0_i32_1 = arith.constant 0 : i32
    return %c0_i32, %c0_i32_0 : i32, i32
  }
  func.func @transform_6(%arg0: i32) -> (i32, i32) {
    %c0_i32 = arith.constant 0 : i32
    %c0_i32_0 = arith.constant 0 : i32
    %c0_i32_1 = arith.constant 0 : i32
    return %c0_i32, %c0_i32_0 : i32, i32
  }
  func.func @transform_7(%arg0: i32) -> (i32, i32) {
    %c0_i32 = arith.constant 0 : i32
    %c0_i32_0 = arith.constant 0 : i32
    %c0_i32_1 = arith.constant 0 : i32
    return %c0_i32, %c0_i32_0 : i32, i32
  }
  func.func @transform_8(%arg0: i32) -> (i32, i32) {
    %c0_i32 = arith.constant 0 : i32
    %c0_i32_0 = arith.constant 0 : i32
    %c0_i32_1 = arith.constant 0 : i32
    return %c0_i32, %c0_i32_0 : i32, i32
  }
  func.func @transform_9(%arg0: i32) -> (i32, i32) {
    %c0_i32 = arith.constant 0 : i32
    %c0_i32_0 = arith.constant 0 : i32
    return %arg0, %c0_i32 : i32, i32
  }
}

</mosaic_0001>

<bundles_post_ra>
// kernel: tpu_custom_call.1
= control target key start
LH: loop header
LB: loop body
LE: loop exit
PB: predicated region body
PF: predicated region fallthrough
CT: control target
= control target key end

     0   :  { %14 = vsyncpa [#allocation3], 0  ;;  %s2281_s0 = inlined_call_operand.vmem [shape: f32[8,16], index: 0, kind: input, shape index: {}]   ;;  %s2282_s1 = inlined_call_operand.vmem [shape: bf16[16,512], index: 1, kind: input, shape index: {}]   ;;  %s2283_s2 = inlined_call_operand.vmem [shape: f32[1,512], index: 2, kind: input, shape index: {}]   ;;  %s2284_s3 = inlined_call_operand.hbm [shape: bf16[512,512], index: 3, kind: input, shape index: {}]   ;;  %s2285_s4 = inlined_call_operand.vmem [shape: f32[1,512], index: 4, kind: input, shape index: {}]   ;;  %s2286_s5 = inlined_call_operand.vmem [shape: bf16[256,64], index: 5, kind: input, shape index: {}]   ;;  %s2287_s6 = inlined_call_operand.vmem [shape: f32[1,64], index: 6, kind: input, shape index: {}]   ;;  %s2288_s7 = inlined_call_operand.vmem [shape: bf16[256,64], index: 7, kind: input, shape index: {}]   ;;  %s2289_s8 = inlined_call_operand.vmem [shape: f32[1,64], index: 8, kind: input, shape index: {}]   ;;  %s2290_s9 = inlined_call_operand.hbm [shape: f32[8,128], index: 9, kind: output, shape index: {}]  }
   0x1   :  { %15 = vsyncpa [#allocation4], 0  ;;  %s2047_s30 = smov [#allocation2]   ;;  %s1999_s13 = scalar_lea.hbm %s2284_s3, 16384 }
   0x2   :  { %s27_s10 = sshll.u32 %s2047_s30, 4  ;;  %p2000_p0 = scmp.ne.s32.totalorder %s2284_s3, %s1999_s13  ;;  %s28_s10 = int_to_ptr.vmem [resolvable:$true] %s27_s10 }
   0x3   :  { %p2003_p1 = scmp.lt.u32.totalorder %s1999_s13, %s2284_s3 }
   0x5   :  { %p2005_p2 = pnand %p2003_p1, %p2000_p0 }
   0x7   :  { %2008 = shalt.err (!%p2005_p2)
}
   0x8   :  { %s2009_s18 = scalar_lea.vmem %s28_s10, 16384  ;;  %p2014_p4 = scmp.lt.s32.totalorder %s28_s10, %s28_s10 }
   0x9   :  { %p2010_p3 = scmp.ne.s32.totalorder %s28_s10, %s2009_s18  ;;  %p2015_p5 = scmp.lt.s32.totalorder %s2009_s18, %s2009_s18 }
   0xb   :  { %p2016_p6 = por %p2015_p5, %p2014_p4 }
   0xd   :  { %p2017_p7 = pnand %p2016_p6, %p2010_p3 }
   0xf   :  { %2020 = shalt.err (!%p2017_p7)
}
  0x10   :  { %s2048_s19 = smov 256   ;;  %s2049_s20 = smov 16  }
  0x11   :  { %33 = dma.hbm_to_vmem [thread:$0]  %s2284_s3, 16384, %s28_s10, [#allocation3], %s2048_s19, %s2048_s19, %s2049_s20  }
  0x12   :  { %2043 = dma.done.wait [#allocation3], 16384  }
  0x13   :  { %2044 = vsyncadd [#allocation3], 4294950912  ;;  %v2050_v0 = vmov 0   ;;  %v1763_v1 = vld [vmem:[%s2282_s1 + $0x4] ss:$16 sps:$4 sm:$0xff]   ;;  %vm96_vm0 = vcmask 130048  }
  0x14   :  { %132 = vmatprep.mubr.bf16.mxu0 %v2050_v0  ;;  %173 = vmatprep.mubr.bf16.mxu1 %v2050_v0  ;;  %v1765_v2 = vld [vmem:[%s2282_s1] ss:$16 sps:$4 sm:$0xff]   ;;  %v1766_v5 = vld [vmem:[%s2282_s1 + $0xc] ss:$16 sps:$4 sm:$0xff]   ;;  %v1768_v6 = vld [vmem:[%s2282_s1 + $0x8] ss:$16 sps:$4 sm:$0xff]  }
  0x15   :  { %v48_v3 = vld [vmem:[%s2281_s0] sm:$0xff]  ;;  %100 = vmatprep.subr.bf16.mxu0 %v1763_v1  ;;  %141 = vmatprep.subr.bf16.mxu1 %v1766_v5  ;;  %v1772_v9 = vld [vmem:[#allocation2 + $0x8] ss:$16 sps:$4 sm:$0xff]   ;;  %v1774_v10 = vld [vmem:[#allocation2 + $0xc] ss:$16 sps:$4 sm:$0xff]   ;;  %vm1503_vm1 = vcmask 523264  }
  0x16   :  { %v49_v4 = vpack.c.bf16 %v48_v3, %v48_v3  ;;  %101 = vmatpush1.bf16.msra.mxu0 %v1765_v2  ;;  %v1769_v7 = vld [vmem:[#allocation2] ss:$16 sps:$4 sm:$0xff]   ;;  %v1771_v8 = vld [vmem:[#allocation2 + $0x4] ss:$16 sps:$4 sm:$0xff]   ;;  %142 = vmatpush1.bf16.msra.mxu1 %v1768_v6  ;;  %v1780_v13 = vld [vmem:[#allocation2 + $0x2c] ss:$16 sps:$4 sm:$0xff]  }
  0x17   :  { %980 = vmatprep.subr.bf16.mxu0 %v1771_v8  ;;  %v1777_v11 = vld [vmem:[#allocation2 + $0x24] ss:$16 sps:$4 sm:$0xff]   ;;  %1062 = vmatprep.subr.bf16.mxu1 %v1774_v10  ;;  %v1775_v12 = vld [vmem:[#allocation2 + $0x20] ss:$16 sps:$4 sm:$0xff]   ;;  %v1778_v14 = vld [vmem:[#allocation2 + $0x28] ss:$16 sps:$4 sm:$0xff]  }
  0x18   :  { %v1783_v15 = vld [vmem:[#allocation2 + $0x44] ss:$16 sps:$4 sm:$0xff]   ;;  %v1786_v16 = vld [vmem:[#allocation2 + $0x4c] ss:$16 sps:$4 sm:$0xff]   ;;  %v1781_v17 = vld [vmem:[#allocation2 + $0x40] ss:$16 sps:$4 sm:$0xff]  }
  0x19   :  { %1536 = vmatmul.mubr.msk.bf16.vlgmr.msra.gmra.mrb[0].mxu0 %vm96_vm0, %v49_v4  ;;  %1537 = vmatmul.mubr.msk.bf16.vlgmr.msra.gmra.mrb[0].mxu1 %vm96_vm0, %v49_v4  ;;  %v1789_v18 = vld [vmem:[#allocation2 + $0x64] ss:$16 sps:$4 sm:$0xff]   ;;  %v1784_v19 = vld [vmem:[#allocation2 + $0x48] ss:$16 sps:$4 sm:$0xff]   ;;  %v1792_v20 = vld [vmem:[#allocation2 + $0x6c] ss:$16 sps:$4 sm:$0xff]  }
  0x1a   :  { %981 = vmatpush1.bf16.msra.mxu0 %v1769_v7  ;;  %1063 = vmatpush1.bf16.msra.mxu1 %v1772_v9  ;;  %v1787_v21 = vld [vmem:[#allocation2 + $0x60] ss:$16 sps:$4 sm:$0xff]   ;;  %v1795_v22 = vld [vmem:[#allocation2 + $0x84] ss:$16 sps:$4 sm:$0xff]   ;;  %v1790_v23 = vld [vmem:[#allocation2 + $0x68] ss:$16 sps:$4 sm:$0xff]   ;;  %v56_v9 = vlaneseq }
  0x1b   :  { %982 = vmatprep.subr.bf16.mxu0 %v1777_v11  ;;  %1064 = vmatprep.subr.bf16.mxu1 %v1780_v13  ;;  %v1798_v24 = vld [vmem:[#allocation2 + $0x8c] ss:$16 sps:$4 sm:$0xff]   ;;  %v1793_v25 = vld [vmem:[#allocation2 + $0x80] ss:$16 sps:$4 sm:$0xff]   ;;  %v1801_v26 = vld [vmem:[#allocation2 + $0xa4] ss:$16 sps:$4 sm:$0xff]  }
  0x1c   :  { %v1796_v27 = vld [vmem:[#allocation2 + $0x88] ss:$16 sps:$4 sm:$0xff]   ;;  %v1804_v28 = vld [vmem:[#allocation2 + $0xac] ss:$16 sps:$4 sm:$0xff]   ;;  %v1799_v29 = vld [vmem:[#allocation2 + $0xa0] ss:$16 sps:$4 sm:$0xff]  }
  0x1d   :  { %v1807_v30 = vld [vmem:[#allocation2 + $0xc4] ss:$16 sps:$4 sm:$0xff]   ;;  %v1802_v31 = vld [vmem:[#allocation2 + $0xa8] ss:$16 sps:$4 sm:$0xff]   ;;  %v1810_v32 = vld [vmem:[#allocation2 + $0xcc] ss:$16 sps:$4 sm:$0xff]  }
  0x1e   :  { %983 = vmatpush1.bf16.msra.mxu0 %v1775_v12  ;;  %1065 = vmatpush1.bf16.msra.mxu1 %v1778_v14  ;;  %v1805_v33 = vld [vmem:[#allocation2 + $0xc0] ss:$16 sps:$4 sm:$0xff]   ;;  %v1813_v34 = vld [vmem:[#allocation2 + $0xe4] ss:$16 sps:$4 sm:$0xff]   ;;  %v1808_v35 = vld [vmem:[#allocation2 + $0xc8] ss:$16 sps:$4 sm:$0xff]  }
  0x1f   :  { %984 = vmatprep.subr.bf16.mxu0 %v1783_v15  ;;  %1066 = vmatprep.subr.bf16.mxu1 %v1786_v16  ;;  %v1816_v36 = vld [vmem:[#allocation2 + $0xec] ss:$16 sps:$4 sm:$0xff]   ;;  %v1811_v37 = vld [vmem:[#allocation2 + $0xe0] ss:$16 sps:$4 sm:$0xff]   ;;  %v1819_v38 = vld [vmem:[#allocation2 + $0x104] ss:$16 sps:$4 sm:$0xff]  }
  0x20   :  { %v1814_v39 = vld [vmem:[#allocation2 + $0xe8] ss:$16 sps:$4 sm:$0xff]   ;;  %v1822_v40 = vld [vmem:[#allocation2 + $0x10c] ss:$16 sps:$4 sm:$0xff]   ;;  %v1817_v41 = vld [vmem:[#allocation2 + $0x100] ss:$16 sps:$4 sm:$0xff]  }
  0x21   :  { %v1825_v42 = vld [vmem:[#allocation2 + $0x124] ss:$16 sps:$4 sm:$0xff]   ;;  %v1820_v43 = vld [vmem:[#allocation2 + $0x108] ss:$16 sps:$4 sm:$0xff]   ;;  %v1823_v44 = vld [vmem:[#allocation2 + $0x120] ss:$16 sps:$4 sm:$0xff]  }
  0x22   :  { %985 = vmatpush1.bf16.msra.mxu0 %v1781_v17  ;;  %1067 = vmatpush1.bf16.msra.mxu1 %v1784_v19  ;;  %v1828_v45 = vld [vmem:[#allocation2 + $0x12c] ss:$16 sps:$4 sm:$0xff]   ;;  %v1826_v46 = vld [vmem:[#allocation2 + $0x128] ss:$16 sps:$4 sm:$0xff]   ;;  %v1831_v47 = vld [vmem:[#allocation2 + $0x144] ss:$16 sps:$4 sm:$0xff]  }
  0x23   :  { %986 = vmatprep.subr.bf16.mxu0 %v1789_v18  ;;  %1068 = vmatprep.subr.bf16.mxu1 %v1792_v20  ;;  %v1834_v48 = vld [vmem:[#allocation2 + $0x14c] ss:$16 sps:$4 sm:$0xff]   ;;  %v1829_v49 = vld [vmem:[#allocation2 + $0x140] ss:$16 sps:$4 sm:$0xff]   ;;  %v1837_v50 = vld [vmem:[#allocation2 + $0x164] ss:$16 sps:$4 sm:$0xff]  }
  0x24   :  { %v1832_v51 = vld [vmem:[#allocation2 + $0x148] ss:$16 sps:$4 sm:$0xff]   ;;  %v1840_v52 = vld [vmem:[#allocation2 + $0x16c] ss:$16 sps:$4 sm:$0xff]   ;;  %v1835_v53 = vld [vmem:[#allocation2 + $0x160] ss:$16 sps:$4 sm:$0xff]  }
  0x25   :  { %v1843_v54 = vld [vmem:[#allocation2 + $0x184] ss:$16 sps:$4 sm:$0xff]   ;;  %v1838_v55 = vld [vmem:[#allocation2 + $0x168] ss:$16 sps:$4 sm:$0xff]   ;;  %v1846_v56 = vld [vmem:[#allocation2 + $0x18c] ss:$16 sps:$4 sm:$0xff]  }
  0x26   :  { %987 = vmatpush1.bf16.msra.mxu0 %v1787_v21  ;;  %1069 = vmatpush1.bf16.msra.mxu1 %v1790_v23  ;;  %v1841_v57 = vld [vmem:[#allocation2 + $0x180] ss:$16 sps:$4 sm:$0xff]   ;;  %v1849_v58 = vld [vmem:[#allocation2 + $0x1a4] ss:$16 sps:$4 sm:$0xff]   ;;  %v1844_v59 = vld [vmem:[#allocation2 + $0x188] ss:$16 sps:$4 sm:$0xff]  }
  0x27   :  { %988 = vmatprep.subr.bf16.mxu0 %v1795_v22  ;;  %1070 = vmatprep.subr.bf16.mxu1 %v1798_v24  ;;  %v1852_v60 = vld [vmem:[#allocation2 + $0x1ac] ss:$16 sps:$4 sm:$0xff]   ;;  %v1847_v61 = vld [vmem:[#allocation2 + $0x1a0] ss:$16 sps:$4 sm:$0xff]   ;;  %v1850_v62 = vld [vmem:[#allocation2 + $0x1a8] ss:$16 sps:$4 sm:$0xff]  }
  0x28   :  { %v1855_v63 = vld [vmem:[#allocation2 + $0x1c4] ss:$16 sps:$4 sm:$0xff]   ;;  %v1858_v0 = vld [vmem:[#allocation2 + $0x1cc] ss:$16 sps:$4 sm:$0xff]   ;;  %v1853_v1 = vld [vmem:[#allocation2 + $0x1c0] ss:$16 sps:$4 sm:$0xff]  }
  0x29   :  { %v1856_v2 = vld [vmem:[#allocation2 + $0x1c8] ss:$16 sps:$4 sm:$0xff]   ;;  %v1861_v3 = vld [vmem:[#allocation2 + $0x1e4] ss:$16 sps:$4 sm:$0xff]   ;;  %v1864_v4 = vld [vmem:[#allocation2 + $0x1ec] ss:$16 sps:$4 sm:$0xff]  }
  0x2a   :  { %989 = vmatpush1.bf16.msra.mxu0 %v1793_v25  ;;  %1071 = vmatpush1.bf16.msra.mxu1 %v1796_v27  ;;  %v1859_v5 = vld [vmem:[#allocation2 + $0x1e0] ss:$16 sps:$4 sm:$0xff]   ;;  %v1862_v6 = vld [vmem:[#allocation2 + $0x1e8] ss:$16 sps:$4 sm:$0xff]   ;;  %v1867_v7 = vld [vmem:[#allocation2 + $0x204] ss:$16 sps:$4 sm:$0xff]  }
  0x2b   :  { %990 = vmatprep.subr.bf16.mxu0 %v1801_v26  ;;  %1072 = vmatprep.subr.bf16.mxu1 %v1804_v28  ;;  %v1870_v8 = vld [vmem:[#allocation2 + $0x20c] ss:$16 sps:$4 sm:$0xff]   ;;  %v2130_v10 = vshrl.u32 %v56_v9, 7  ;;  %v2136_v12 = vld [vmem:[%s2283_s2] sm:$0xf]  ;;  %vm1515_vm2 = vcmask 1048064  }
  0x2c   :  { %v1927_v9 = vld [vmem:[#allocation2 + $0x344] ss:$16 sps:$4 sm:$0xff]  }
  0x2d   :  { %v58_v11 = vsub.s32 0, %v2130_v10  ;;  %v62_v13 = vsub.s32 1, %v2130_v10  ;;  %v70_v14 = vsub.s32 3, %v2130_v10 }
  0x2e   :  { %991 = vmatpush1.bf16.msra.mxu0 %v1799_v29  ;;  %1073 = vmatpush1.bf16.msra.mxu1 %v1802_v31 }
  0x2f   :  { %992 = vmatprep.subr.bf16.mxu0 %v1807_v30  ;;  %1074 = vmatprep.subr.bf16.mxu1 %v1810_v32  ;;  %v59_v15 = vrot.slane %v2136_v12, %v58_v11  ;;  %v63_v16 = vrot.slane %v2136_v12, %v62_v13  ;;  %v71_v18 = vrot.slane %v2136_v12, %v70_v14  ;;  %v1865_v32 = vld [vmem:[#allocation2 + $0x200] ss:$16 sps:$4 sm:$0xff]  }
  0x32   :  { %993 = vmatpush1.bf16.msra.mxu0 %v1805_v33  ;;  %1075 = vmatpush1.bf16.msra.mxu1 %v1808_v35  ;;  %v1868_v33 = vld [vmem:[#allocation2 + $0x208] ss:$16 sps:$4 sm:$0xff]  }
  0x33   :  { %994 = vmatprep.subr.bf16.mxu0 %v1813_v34  ;;  %1076 = vmatprep.subr.bf16.mxu1 %v1816_v36  ;;  %v1873_v36 = vld [vmem:[#allocation2 + $0x224] ss:$16 sps:$4 sm:$0xff]  }
  0x36   :  { %995 = vmatpush1.bf16.msra.mxu0 %v1811_v37  ;;  %1077 = vmatpush1.bf16.msra.mxu1 %v1814_v39  ;;  %v1876_v37 = vld [vmem:[#allocation2 + $0x22c] ss:$16 sps:$4 sm:$0xff]   ;;  %v1871_v39 = vld [vmem:[#allocation2 + $0x220] ss:$16 sps:$4 sm:$0xff]  }
  0x37   :  { %996 = vmatprep.subr.bf16.mxu0 %v1819_v38  ;;  %1078 = vmatprep.subr.bf16.mxu1 %v1822_v40  ;;  %v1874_v40 = vld [vmem:[#allocation2 + $0x228] ss:$16 sps:$4 sm:$0xff]  }
  0x3a   :  { %997 = vmatpush1.bf16.msra.mxu0 %v1817_v41  ;;  %1079 = vmatpush1.bf16.msra.mxu1 %v1820_v43  ;;  %v1879_v41 = vld [vmem:[#allocation2 + $0x244] ss:$16 sps:$4 sm:$0xff]   ;;  %v1877_v43 = vld [vmem:[#allocation2 + $0x240] ss:$16 sps:$4 sm:$0xff]  }
  0x3b   :  { %998 = vmatprep.subr.bf16.mxu0 %v1825_v42  ;;  %1080 = vmatprep.subr.bf16.mxu1 %v1828_v45  ;;  %v1882_v42 = vld [vmem:[#allocation2 + $0x24c] ss:$16 sps:$4 sm:$0xff]   ;;  %v1885_v45 = vld [vmem:[#allocation2 + $0x264] ss:$16 sps:$4 sm:$0xff]  }
  0x3e   :  { %999 = vmatpush1.bf16.msra.mxu0 %v1823_v44  ;;  %1081 = vmatpush1.bf16.msra.mxu1 %v1826_v46  ;;  %v1880_v44 = vld [vmem:[#allocation2 + $0x248] ss:$16 sps:$4 sm:$0xff]   ;;  %v1888_v46 = vld [vmem:[#allocation2 + $0x26c] ss:$16 sps:$4 sm:$0xff]  }
  0x3f   :  { %1000 = vmatprep.subr.bf16.mxu0 %v1831_v47  ;;  %1082 = vmatprep.subr.bf16.mxu1 %v1834_v48  ;;  %v1883_v47 = vld [vmem:[#allocation2 + $0x260] ss:$16 sps:$4 sm:$0xff]   ;;  %v1886_v48 = vld [vmem:[#allocation2 + $0x268] ss:$16 sps:$4 sm:$0xff]  }
  0x42   :  { %1001 = vmatpush1.bf16.msra.mxu0 %v1829_v49  ;;  %1083 = vmatpush1.bf16.msra.mxu1 %v1832_v51  ;;  %v1891_v49 = vld [vmem:[#allocation2 + $0x284] ss:$16 sps:$4 sm:$0xff]   ;;  %v1889_v51 = vld [vmem:[#allocation2 + $0x280] ss:$16 sps:$4 sm:$0xff]  }
  0x43   :  { %1002 = vmatprep.subr.bf16.mxu0 %v1837_v50  ;;  %1084 = vmatprep.subr.bf16.mxu1 %v1840_v52  ;;  %v1894_v50 = vld [vmem:[#allocation2 + $0x28c] ss:$16 sps:$4 sm:$0xff]   ;;  %v1892_v52 = vld [vmem:[#allocation2 + $0x288] ss:$16 sps:$4 sm:$0xff]  }
  0x46   :  { %1003 = vmatpush1.bf16.msra.mxu0 %v1835_v53  ;;  %1085 = vmatpush1.bf16.msra.mxu1 %v1838_v55  ;;  %v1897_v53 = vld [vmem:[#allocation2 + $0x2a4] ss:$16 sps:$4 sm:$0xff]   ;;  %v1895_v55 = vld [vmem:[#allocation2 + $0x2a0] ss:$16 sps:$4 sm:$0xff]  }
  0x47   :  { %1004 = vmatprep.subr.bf16.mxu0 %v1843_v54  ;;  %1086 = vmatprep.subr.bf16.mxu1 %v1846_v56  ;;  %v1900_v54 = vld [vmem:[#allocation2 + $0x2ac] ss:$16 sps:$4 sm:$0xff]   ;;  %v1898_v56 = vld [vmem:[#allocation2 + $0x2a8] ss:$16 sps:$4 sm:$0xff]  }
  0x4a   :  { %1005 = vmatpush1.bf16.msra.mxu0 %v1841_v57  ;;  %1087 = vmatpush1.bf16.msra.mxu1 %v1844_v59  ;;  %v1903_v57 = vld [vmem:[#allocation2 + $0x2c4] ss:$16 sps:$4 sm:$0xff]   ;;  %v1901_v59 = vld [vmem:[#allocation2 + $0x2c0] ss:$16 sps:$4 sm:$0xff]  }
  0x4b   :  { %1006 = vmatprep.subr.bf16.mxu0 %v1849_v58  ;;  %1088 = vmatprep.subr.bf16.mxu1 %v1852_v60  ;;  %v1906_v58 = vld [vmem:[#allocation2 + $0x2cc] ss:$16 sps:$4 sm:$0xff]   ;;  %v1904_v60 = vld [vmem:[#allocation2 + $0x2c8] ss:$16 sps:$4 sm:$0xff]  }
  0x4e   :  { %1007 = vmatpush1.bf16.msra.mxu0 %v1847_v61  ;;  %1089 = vmatpush1.bf16.msra.mxu1 %v1850_v62  ;;  %v1909_v61 = vld [vmem:[#allocation2 + $0x2e4] ss:$16 sps:$4 sm:$0xff]   ;;  %v1912_v62 = vld [vmem:[#allocation2 + $0x2ec] ss:$16 sps:$4 sm:$0xff]  }
  0x4f   :  { %1008 = vmatprep.subr.bf16.mxu0 %v1855_v63  ;;  %1090 = vmatprep.subr.bf16.mxu1 %v1858_v0  ;;  %v1907_v63 = vld [vmem:[#allocation2 + $0x2e0] ss:$16 sps:$4 sm:$0xff]   ;;  %v1910_v0 = vld [vmem:[#allocation2 + $0x2e8] ss:$16 sps:$4 sm:$0xff]  }
  0x52   :  { %1009 = vmatpush1.bf16.msra.mxu0 %v1853_v1  ;;  %1091 = vmatpush1.bf16.msra.mxu1 %v1856_v2  ;;  %v1915_v1 = vld [vmem:[#allocation2 + $0x304] ss:$16 sps:$4 sm:$0xff]   ;;  %v1918_v2 = vld [vmem:[#allocation2 + $0x30c] ss:$16 sps:$4 sm:$0xff]  }
  0x53   :  { %1010 = vmatprep.subr.bf16.mxu0 %v1861_v3  ;;  %1092 = vmatprep.subr.bf16.mxu1 %v1864_v4  ;;  %v1913_v3 = vld [vmem:[#allocation2 + $0x300] ss:$16 sps:$4 sm:$0xff]   ;;  %v1916_v4 = vld [vmem:[#allocation2 + $0x308] ss:$16 sps:$4 sm:$0xff]  }
  0x56   :  { %1011 = vmatpush1.bf16.msra.mxu0 %v1859_v5  ;;  %1093 = vmatpush1.bf16.msra.mxu1 %v1862_v6  ;;  %v1921_v5 = vld [vmem:[#allocation2 + $0x324] ss:$16 sps:$4 sm:$0xff]   ;;  %v1924_v6 = vld [vmem:[#allocation2 + $0x32c] ss:$16 sps:$4 sm:$0xff]  }
  0x57   :  { %1021 = vmatprep.subr.bf16.mxu0 %v1867_v7  ;;  %1103 = vmatprep.subr.bf16.mxu1 %v1870_v8  ;;  %v1919_v7 = vld [vmem:[#allocation2 + $0x320] ss:$16 sps:$4 sm:$0xff]   ;;  %v1922_v8 = vld [vmem:[#allocation2 + $0x328] ss:$16 sps:$4 sm:$0xff]  }
  0xec   :  { %v134_v17 = vpop.f32.mrb[0].mxu0  ;;  %v2149_v23 = vpop.f32.mrb[0].mxu1 }
  0xed   :  { %v135_v19 = vadd.f32 %v134_v17, %v59_v15  ;;  %v136_v20 = vpop.f32.mrb[1].mxu0  ;;  %v177_v26 = vpop.f32.mrb[1].mxu1  ;;  %v1930_v15 = vld [vmem:[#allocation2 + $0x34c] ss:$16 sps:$4 sm:$0xff]   ;;  %v1928_v17 = vld [vmem:[#allocation2 + $0x348] ss:$16 sps:$4 sm:$0xff]  }
  0xee   :  { %v137_v21 = vadd.f32 %v136_v20, %v63_v16  ;;  %v138_v22 = vpop.f32.mrb[2].mxu0  ;;  %v178_v28 = vadd.f32 %v177_v26, %v71_v18  ;;  %v179_v29 = vpop.f32.mrb[2].mxu1  ;;  %v1925_v16 = vld [vmem:[#allocation2 + $0x340] ss:$16 sps:$4 sm:$0xff]   ;;  %v1933_v18 = vld [vmem:[#allocation2 + $0x364] ss:$16 sps:$4 sm:$0xff]  }
  0xef   :  { %v182_v24 = vmax.f32 %v135_v19, 0.0  ;;  %v139_v25 = vpop.f32.mrb[3].mxu0  ;;  %v180_v30 = vpop.f32.mrb[3].mxu1  ;;  %v1936_v19 = vld [vmem:[#allocation2 + $0x36c] ss:$16 sps:$4 sm:$0xff]  }
  0xf0   :  { %v183_v27 = vmax.f32 %v137_v21, 0.0  ;;  %v185_v34 = vmax.f32 %v178_v28, 0.0  ;;  %v1931_v20 = vld [vmem:[#allocation2 + $0x360] ss:$16 sps:$4 sm:$0xff]   ;;  %v1934_v21 = vld [vmem:[#allocation2 + $0x368] ss:$16 sps:$4 sm:$0xff]  }
  0xf1   :  { %v186_v35 = vpack.c.bf16 %v182_v24, %v182_v24  ;;  %v1939_v22 = vld [vmem:[#allocation2 + $0x384] ss:$16 sps:$4 sm:$0xff]   ;;  %v1942_v24 = vld [vmem:[#allocation2 + $0x38c] ss:$16 sps:$4 sm:$0xff]   ;;  %v1937_v25 = vld [vmem:[#allocation2 + $0x380] ss:$16 sps:$4 sm:$0xff]  }
  0xf2   :  { %v187_v31 = vpack.c.bf16 %v183_v27, %v183_v27  ;;  %v189_v38 = vpack.c.bf16 %v185_v34, %v185_v34  ;;  %v1940_v26 = vld [vmem:[#allocation2 + $0x388] ss:$16 sps:$4 sm:$0xff]   ;;  %v66_v27 = vsub.s32 2, %v2130_v10  ;;  %v1945_v28 = vld [vmem:[#allocation2 + $0x3a4] ss:$16 sps:$4 sm:$0xff]  }
  0xf3   :  { %v1948_v29 = vld [vmem:[#allocation2 + $0x3ac] ss:$16 sps:$4 sm:$0xff]   ;;  %v1943_v30 = vld [vmem:[#allocation2 + $0x3a0] ss:$16 sps:$4 sm:$0xff]  }
  0xf4   :  { %1012 = vmatprep.mubr.bf16.mxu0 %v187_v31  ;;  %1094 = vmatprep.mubr.bf16.mxu1 %v187_v31  ;;  %v1946_v31 = vld [vmem:[#allocation2 + $0x3a8] ss:$16 sps:$4 sm:$0xff]   ;;  %v1954_v34 = vld [vmem:[#allocation2 + $0x3cc] ss:$16 sps:$4 sm:$0xff]  }
  0xf5   :  { %1013 = vmatmul.mubr.bf16.vlgmr.msra.gmra.mrb[4].mxu0 %v186_v35  ;;  %1095 = vmatmul.mubr.bf16.vlgmr.msra.gmra.mrb[4].mxu1 %v186_v35  ;;  %v1949_v35 = vld [vmem:[#allocation2 + $0x3c0] ss:$16 sps:$4 sm:$0xff]  }
  0xf6   :  { %1022 = vmatpush1.bf16.msra.mxu0 %v1865_v32  ;;  %1104 = vmatpush1.bf16.msra.mxu1 %v1868_v33  ;;  %v67_v32 = vrot.slane %v2136_v12, %v66_v27  ;;  %v1951_v33 = vld [vmem:[#allocation2 + $0x3c4] ss:$16 sps:$4 sm:$0xff]  }
  0xf7   :  { %1023 = vmatprep.subr.bf16.mxu0 %v1873_v36  ;;  %1105 = vmatprep.subr.bf16.mxu1 %v1876_v37  ;;  %v1952_v36 = vld [vmem:[#allocation2 + $0x3c8] ss:$16 sps:$4 sm:$0xff]   ;;  %v1961_v12 = vld [vmem:[%s2286_s5 + $0x40] sm:$0xff]  }
  0xf8   :  { %1053 = vmatprep.mubr.bf16.mxu0 %v189_v38  ;;  %1135 = vmatprep.mubr.bf16.mxu1 %v189_v38  ;;  %v176_v37 = vadd.f32 %v2149_v23, %v67_v32  ;;  %v1957_v38 = vld [vmem:[#allocation2 + $0x3e4] ss:$16 sps:$4 sm:$0xff]  }
  0xf9   :  { %v1963_v23 = vld [vmem:[%s2286_s5] sm:$0xff]  }
  0xfa   :  { %1024 = vmatpush1.bf16.msra.mxu0 %v1871_v39  ;;  %1106 = vmatpush1.bf16.msra.mxu1 %v1874_v40  ;;  %v1960_v39 = vld [vmem:[#allocation2 + $0x3ec] ss:$16 sps:$4 sm:$0xff]   ;;  %v1955_v40 = vld [vmem:[#allocation2 + $0x3e0] ss:$16 sps:$4 sm:$0xff]  }
  0xfb   :  { %1025 = vmatprep.subr.bf16.mxu0 %v1879_v41  ;;  %1107 = vmatprep.subr.bf16.mxu1 %v1882_v42  ;;  %v1958_v41 = vld [vmem:[#allocation2 + $0x3e8] ss:$16 sps:$4 sm:$0xff]   ;;  %v184_v42 = vmax.f32 %v176_v37, 0.0 }
  0xfe   :  { %1026 = vmatpush1.bf16.msra.mxu0 %v1877_v43  ;;  %1108 = vmatpush1.bf16.msra.mxu1 %v1880_v44  ;;  %v1962_v43 = vld [vmem:[%s2288_s7 + $0x40] sm:$0xff]  }
  0xff   :  { %1027 = vmatprep.subr.bf16.mxu0 %v1885_v45  ;;  %1109 = vmatprep.subr.bf16.mxu1 %v1888_v46  ;;  %v1964_v44 = vld [vmem:[%s2288_s7] sm:$0xff]   ;;  %v188_v45 = vpack.c.bf16 %v184_v42, %v184_v42  ;;  %v1965_v46 = vld [vmem:[%s2286_s5 + $0x48] sm:$0xff]  }
 0x102   :  { %1028 = vmatpush1.bf16.msra.mxu0 %v1883_v47  ;;  %1110 = vmatpush1.bf16.msra.mxu1 %v1886_v48  ;;  %v1966_v47 = vld [vmem:[%s2288_s7 + $0x48] sm:$0xff]  }
 0x103   :  { %1029 = vmatprep.subr.bf16.mxu0 %v1891_v49  ;;  %1111 = vmatprep.subr.bf16.mxu1 %v1894_v50  ;;  %v1967_v48 = vld [vmem:[%s2286_s5 + $0x8] sm:$0xff]   ;;  %v1969_v50 = vld [vmem:[%s2286_s5 + $0x50] sm:$0xff]  }
 0x104   :  { %v1968_v49 = vld [vmem:[%s2288_s7 + $0x8] sm:$0xff]  }
 0x106   :  { %1030 = vmatpush1.bf16.msra.mxu0 %v1889_v51  ;;  %1112 = vmatpush1.bf16.msra.mxu1 %v1892_v52  ;;  %v1970_v51 = vld [vmem:[%s2288_s7 + $0x50] sm:$0xff]  }
 0x107   :  { %1031 = vmatprep.subr.bf16.mxu0 %v1897_v53  ;;  %1113 = vmatprep.subr.bf16.mxu1 %v1900_v54  ;;  %v1971_v52 = vld [vmem:[%s2286_s5 + $0x10] sm:$0xff]   ;;  %v1973_v54 = vld [vmem:[%s2286_s5 + $0x58] sm:$0xff]  }
 0x108   :  { %v1972_v53 = vld [vmem:[%s2288_s7 + $0x10] sm:$0xff]  }
 0x10a   :  { %1032 = vmatpush1.bf16.msra.mxu0 %v1895_v55  ;;  %1114 = vmatpush1.bf16.msra.mxu1 %v1898_v56  ;;  %v1974_v55 = vld [vmem:[%s2288_s7 + $0x58] sm:$0xff]  }
 0x10b   :  { %1033 = vmatprep.subr.bf16.mxu0 %v1903_v57  ;;  %1115 = vmatprep.subr.bf16.mxu1 %v1906_v58  ;;  %v1975_v56 = vld [vmem:[%s2286_s5 + $0x18] sm:$0xff]   ;;  %v1977_v58 = vld [vmem:[%s2286_s5 + $0x60] sm:$0xff]  }
 0x10c   :  { %v1976_v57 = vld [vmem:[%s2288_s7 + $0x18] sm:$0xff]  }
 0x10e   :  { %1034 = vmatpush1.bf16.msra.mxu0 %v1901_v59  ;;  %1116 = vmatpush1.bf16.msra.mxu1 %v1904_v60  ;;  %v1978_v59 = vld [vmem:[%s2288_s7 + $0x60] sm:$0xff]  }
 0x10f   :  { %1035 = vmatprep.subr.bf16.mxu0 %v1909_v61  ;;  %1117 = vmatprep.subr.bf16.mxu1 %v1912_v62  ;;  %v1979_v60 = vld [vmem:[%s2286_s5 + $0x20] sm:$0xff]   ;;  %v1981_v62 = vld [vmem:[%s2286_s5 + $0x68] sm:$0xff]  }
 0x110   :  { %v1980_v61 = vld [vmem:[%s2288_s7 + $0x20] sm:$0xff]  }
 0x112   :  { %1036 = vmatpush1.bf16.msra.mxu0 %v1907_v63  ;;  %1118 = vmatpush1.bf16.msra.mxu1 %v1910_v0  ;;  %v1982_v63 = vld [vmem:[%s2288_s7 + $0x68] sm:$0xff]  }
 0x113   :  { %1037 = vmatprep.subr.bf16.mxu0 %v1915_v1  ;;  %1119 = vmatprep.subr.bf16.mxu1 %v1918_v2  ;;  %v1983_v0 = vld [vmem:[%s2286_s5 + $0x28] sm:$0xff]   ;;  %v1985_v2 = vld [vmem:[%s2286_s5 + $0x70] sm:$0xff]  }
 0x114   :  { %v1984_v1 = vld [vmem:[%s2288_s7 + $0x28] sm:$0xff]  }
 0x116   :  { %1038 = vmatpush1.bf16.msra.mxu0 %v1913_v3  ;;  %1120 = vmatpush1.bf16.msra.mxu1 %v1916_v4  ;;  %v1986_v3 = vld [vmem:[%s2288_s7 + $0x70] sm:$0xff]  }
 0x117   :  { %1039 = vmatprep.subr.bf16.mxu0 %v1921_v5  ;;  %1121 = vmatprep.subr.bf16.mxu1 %v1924_v6  ;;  %v1987_v4 = vld [vmem:[%s2286_s5 + $0x30] sm:$0xff]   ;;  %v1989_v6 = vld [vmem:[%s2286_s5 + $0x78] sm:$0xff]  }
 0x118   :  { %v1988_v5 = vld [vmem:[%s2288_s7 + $0x30] sm:$0xff]  }
 0x11a   :  { %1040 = vmatpush1.bf16.msra.mxu0 %v1919_v7  ;;  %1122 = vmatpush1.bf16.msra.mxu1 %v1922_v8  ;;  %v1990_v7 = vld [vmem:[%s2288_s7 + $0x78] sm:$0xff]  }
 0x11b   :  { %1041 = vmatprep.subr.bf16.mxu0 %v1927_v9  ;;  %1123 = vmatprep.subr.bf16.mxu1 %v1930_v15  ;;  %v1991_v8 = vld [vmem:[%s2286_s5 + $0x38] sm:$0xff]   ;;  %v318_v15 = vld [vmem:[%s2285_s4] sm:$0xf] }
 0x11c   :  { %v1992_v9 = vld [vmem:[%s2288_s7 + $0x38] sm:$0xff]  }
 0x11e   :  { %1042 = vmatpush1.bf16.msra.mxu0 %v1925_v16  ;;  %1124 = vmatpush1.bf16.msra.mxu1 %v1928_v17  ;;  %v323_v16 = vrot.slane %v318_v15, %v58_v11  ;;  %v331_v17 = vrot.slane %v318_v15, %v66_v27 }
 0x11f   :  { %1043 = vmatprep.subr.bf16.mxu0 %v1933_v18  ;;  %1125 = vmatprep.subr.bf16.mxu1 %v1936_v19  ;;  %v327_v18 = vrot.slane %v318_v15, %v62_v13  ;;  %v335_v19 = vrot.slane %v318_v15, %v70_v14 }
 0x122   :  { %1044 = vmatpush1.bf16.msra.mxu0 %v1931_v20  ;;  %1126 = vmatpush1.bf16.msra.mxu1 %v1934_v21 }
 0x123   :  { %1045 = vmatprep.subr.bf16.mxu0 %v1939_v22  ;;  %1127 = vmatprep.subr.bf16.mxu1 %v1942_v24 }
 0x126   :  { %1046 = vmatpush1.bf16.msra.mxu0 %v1937_v25  ;;  %1128 = vmatpush1.bf16.msra.mxu1 %v1940_v26 }
 0x127   :  { %1047 = vmatprep.subr.bf16.mxu0 %v1945_v28  ;;  %1129 = vmatprep.subr.bf16.mxu1 %v1948_v29 }
 0x12a   :  { %1048 = vmatpush1.bf16.msra.mxu0 %v1943_v30  ;;  %1130 = vmatpush1.bf16.msra.mxu1 %v1946_v31 }
 0x12b   :  { %1049 = vmatprep.subr.bf16.mxu0 %v1951_v33  ;;  %1131 = vmatprep.subr.bf16.mxu1 %v1954_v34 }
 0x12e   :  { %1050 = vmatpush1.bf16.msra.mxu0 %v1949_v35  ;;  %1132 = vmatpush1.bf16.msra.mxu1 %v1952_v36 }
 0x12f   :  { %1051 = vmatprep.subr.bf16.mxu0 %v1957_v38  ;;  %1133 = vmatprep.subr.bf16.mxu1 %v1960_v39  ;;  %v1666_v39 = vld [vmem:[%s2287_s6] ss:$0 sm:$0xff]  ;;  %s2051_s6 = smov 64  }
 0x132   :  { %1052 = vmatpush1.bf16.msra.mxu0 %v1955_v40  ;;  %1134 = vmatpush1.bf16.msra.mxu1 %v1958_v41  ;;  %v1683_v41 = vld [vmem:[%s2289_s8] ss:$0 sm:$0xff]  ;;  %s2052_s8 = smov [#allocation5]  }
 0x133   :  { %1701 = vmatprep.subr.bf16.mxu0 %v1961_v12  ;;  %1723 = vmatprep.subr.bf16.mxu1 %v1962_v43  ;;  %s1523_s27 = sshll.u32 %s2052_s8, 4  ;;  %s1524_s27 = int_to_ptr.vmem [resolvable:$true] %s1523_s27 }
 0x134   :  { %s2021_s28 = scalar_lea.vmem %s1524_s27, 128  ;;  %p2026_p9 = scmp.lt.s32.totalorder %s1524_s27, %s1524_s27 }
 0x135   :  { %1054 = vmatmul.mubr.bf16.vlgmr.msra.gmra.mrb[4].mxu0 %v188_v45  ;;  %1136 = vmatmul.mubr.bf16.vlgmr.msra.gmra.mrb[4].mxu1 %v188_v45  ;;  %p2022_p8 = scmp.ne.s32.totalorder %s1524_s27, %s2021_s28  ;;  %p2027_p10 = scmp.lt.s32.totalorder %s2021_s28, %s2021_s28 }
 0x136   :  { %1702 = vmatpush3.bf16.msra.mxu0 %v1963_v23  ;;  %1724 = vmatpush3.bf16.msra.mxu1 %v1964_v44 }
 0x137   :  { %1703 = vmatprep.subr.bf16.mxu0 %v1965_v46  ;;  %1725 = vmatprep.subr.bf16.mxu1 %v1966_v47  ;;  %p2028_p11 = por %p2027_p10, %p2026_p9 }
 0x139   :  { %p2029_p12 = pnand %p2028_p11, %p2022_p8 }
 0x13a   :  { %1704 = vmatpush3.bf16.msra.mxu0 %v1967_v48  ;;  %1726 = vmatpush3.bf16.msra.mxu1 %v1968_v49 }
 0x13b   :  { %1705 = vmatprep.subr.bf16.mxu0 %v1969_v50  ;;  %1727 = vmatprep.subr.bf16.mxu1 %v1970_v51 }
 0x13e   :  { %1706 = vmatpush3.bf16.msra.mxu0 %v1971_v52  ;;  %1728 = vmatpush3.bf16.msra.mxu1 %v1972_v53 }
 0x13f   :  { %1707 = vmatprep.subr.bf16.mxu0 %v1973_v54  ;;  %1729 = vmatprep.subr.bf16.mxu1 %v1974_v55 }
 0x142   :  { %1708 = vmatpush3.bf16.msra.mxu0 %v1975_v56  ;;  %1730 = vmatpush3.bf16.msra.mxu1 %v1976_v57 }
 0x143   :  { %1709 = vmatprep.subr.bf16.mxu0 %v1977_v58  ;;  %1731 = vmatprep.subr.bf16.mxu1 %v1978_v59 }
 0x146   :  { %1710 = vmatpush3.bf16.msra.mxu0 %v1979_v60  ;;  %1732 = vmatpush3.bf16.msra.mxu1 %v1980_v61 }
 0x147   :  { %1711 = vmatprep.subr.bf16.mxu0 %v1981_v62  ;;  %1733 = vmatprep.subr.bf16.mxu1 %v1982_v63 }
 0x14a   :  { %1712 = vmatpush3.bf16.msra.mxu0 %v1983_v0  ;;  %1734 = vmatpush3.bf16.msra.mxu1 %v1984_v1 }
 0x14b   :  { %1713 = vmatprep.subr.bf16.mxu0 %v1985_v2  ;;  %1735 = vmatprep.subr.bf16.mxu1 %v1986_v3 }
 0x14e   :  { %1714 = vmatpush3.bf16.msra.mxu0 %v1987_v4  ;;  %1736 = vmatpush3.bf16.msra.mxu1 %v1988_v5 }
 0x14f   :  { %1715 = vmatprep.subr.bf16.mxu0 %v1989_v6  ;;  %1737 = vmatprep.subr.bf16.mxu1 %v1990_v7 }
 0x152   :  { %1716 = vmatpush3.bf16.msra.mxu0 %v1991_v8  ;;  %1738 = vmatpush3.bf16.msra.mxu1 %v1992_v9 }
 0x208   :  { %v1055_v20 = vpop.f32.mrb[4].mxu0  ;;  %v1137_v21 = vpop.f32.mrb[4].mxu1 }
 0x209   :  { %v1745_v22 = vadd.f32 %v1055_v20, %v323_v16  ;;  %v1747_v24 = vadd.f32 %v1137_v21, %v331_v17  ;;  %v1057_v25 = vpop.f32.mrb[5].mxu0  ;;  %v1139_v26 = vpop.f32.mrb[5].mxu1 }
 0x20a   :  { %v1746_v28 = vadd.f32 %v1057_v25, %v327_v18  ;;  %v1748_v29 = vadd.f32 %v1139_v26, %v335_v19  ;;  %v1059_v30 = vpop.f32.mrb[6].mxu0  ;;  %v1141_v31 = vpop.f32.mrb[6].mxu1 }
 0x20b   :  { %v1144_v11 = vmax.f32 %v1745_v22, 0.0  ;;  %v1146_v32 = vmax.f32 %v1747_v24, 0.0  ;;  %v1060_v33 = vpop.f32.mrb[7].mxu0  ;;  %v1142_v27 = vpop.f32.mrb[7].mxu1 }
 0x20c   :  { %v1145_v34 = vmax.f32 %v1746_v28, 0.0  ;;  %v1147_v35 = vmax.f32 %v1748_v29, 0.0 }
 0x20d   :  { %v1148_v10 = vpack.c.bf16 %v1144_v11, %v1144_v11  ;;  %v1150_v14 = vpack.c.bf16 %v1146_v32, %v1146_v32 }
 0x20e   :  { %v1149_v13 = vpack.c.bf16 %v1145_v34, %v1145_v34  ;;  %v1151_v36 = vpack.c.bf16 %v1147_v35, %v1147_v35 }
 0x210   :  { %1319 = vmatprep.mubr.bf16.mxu0 %v1149_v13  ;;  %1494 = vmatprep.mubr.bf16.mxu1 %v1151_v36 }
 0x211   :  { %1320 = vmatmul.mubr.bf16.vlgmr.msra.gmra.mrb[8].mxu0 %v1148_v10  ;;  %1495 = vmatmul.mubr.bf16.vlgmr.msra.gmra.mrb[8].mxu1 %v1150_v14 }
 0x2e4   :  { %v1717_v37 = vpop.f32.mrb[8].mxu0  ;;  %v1739_v38 = vpop.f32.mrb[8].mxu1 }
 0x2e5   :  { %v1718_v40 = vpop.f32.mrb[9].mxu0  ;;  %v1740_v42 = vpop.f32.mrb[9].mxu1 }
 0x2e6   :  { %v1719_v12 = vadd.f32 %v1718_v40, %v1717_v37  ;;  %v1741_v43 = vadd.f32 %v1740_v42, %v1739_v38  ;;  %v1720_v23 = vpop.f32.mrb[10].mxu0  ;;  %v1742_v44 = vpop.f32.mrb[10].mxu1 }
 0x2e7   :  { %v1721_v45 = vpop.f32.mrb[11].mxu0  ;;  %v1743_v46 = vpop.f32.mrb[11].mxu1 }
 0x2e8   :  { %v1322_v47 = vadd.f32 %v1719_v12, %v1666_v39  ;;  %v1497_v48 = vadd.f32 %v1741_v43, %v1683_v41 }
 0x2ea   :  { %1993 = vtanh.f32 %v1322_v47  ;;  %v1700_v49 = vmul.f32 -1.442695, %v1497_v48 }
 0x2ec   :  { %1995 = vpow2.f32 %v1700_v49 }
 0x2f4   :  { %v1994_v50 = vpop.eup %1993 }
 0x2f5   :  { %1504 = vst.msk [vmem:[#allocation5] sm:$0xff] %vm1503_vm1, %v1994_v50 }
 0x2f6   :  { %v1996_v51 = vpop.eup %1995 }
 0x2f7   :  { %v1508_v52 = vadd.f32 1.0, %v1996_v51 }
 0x2f9   :  { %1997 = vrcp.f32 %v1508_v52 }
 0x303   :  { %v1998_v53 = vpop.eup %1997 }
 0x304   :  { %1512 = vrot.lane.b32.xlu0 %v1998_v53, %s2051_s6 }
 0x376   :  { %v1513_v54 = vpop.permute.xlu0 %1512 }
 0x377   :  { %1516 = vst.msk [vmem:[#allocation5] sm:$0xff] %vm1515_vm2, %v1513_v54 }
 0x378   :  { %2032 = shalt.err (!%p2029_p12)
}
 0x379   :  { %s2033_s30 = scalar_lea.hbm %s2290_s9, 128 }
 0x37a   :  { %p2034_p13 = scmp.ne.s32.totalorder %s2290_s9, %s2033_s30  ;;  %p2037_p0 = scmp.lt.u32.totalorder %s2033_s30, %s2290_s9 }
 0x37c   :  { %p2039_p1 = pnand %p2037_p0, %p2034_p13 }
 0x37e   :  { %2042 = shalt.err (!%p2039_p1)
}
 0x37f   :  { %1526 = dma.vmem_to_hbm [thread:$0]  %s1524_s27, 128, %s2290_s9, [#allocation4]  }
 0x380   :  { %2045 = dma.done.wait [#allocation4], 128  }
 0x381   :  { %2046 = vsyncadd [#allocation4], 4294967168 }
 0x382   :  { %1530 = vsyncpa [#allocation3], 1 }
 0x383   :  { %1531 = vsyncpa [#allocation4], 1 }

</bundles_post_ra>
